<compile_context>
chip_gen: v5e
topology: v5e:2x2
jax: 0.10.0
libtpu: 0.0.40
codegen_flags: <defaults>
</compile_context>

<pallas_src>
import functools

import jax
import jax.numpy as jnp
from jax import lax
from jax.experimental import pallas as pl
from jax.experimental.pallas import tpu as pltpu


def _norm_rows_kernel(x_ref, o_ref, *, eps):
    """Normalize each row of a (row_tile, W) block over its last axis."""
    x = x_ref[...].astype(jnp.float32)
    mean = jnp.mean(x, axis=-1, keepdims=True)
    c = x - mean
    var = jnp.mean(c * c, axis=-1, keepdims=True)          # biased variance
    o_ref[...] = (c * lax.rsqrt(var + eps)).astype(o_ref.dtype)


def _norm_packed_kernel(x_ref, seg_ref, o_ref, *, eps, w):
    """Lane-packed variant: block is (row_tile, L) with L = G*W = 128.

    Lane l = g*W + w holds element w of row-group g.  seg_ref is the constant
    (L, L) block-diagonal 0/1 matrix: x @ seg gives every lane the sum over
    its own W-group (reduce + broadcast in a single MXU pass; the MXU is idle
    in this mem-bound kernel, so this is effectively free and keeps all
    VPU work and stores fully lane-dense).
    """
    x = x_ref[...].astype(jnp.float32)
    seg = seg_ref[...]
    inv_w = jnp.float32(1.0 / w)
    sum_b = jnp.dot(x, seg, precision=lax.Precision.HIGHEST,
                    preferred_element_type=jnp.float32)
    c = x - sum_b * inv_w
    ssq_b = jnp.dot(c * c, seg, precision=lax.Precision.HIGHEST,
                    preferred_element_type=jnp.float32)
    o_ref[...] = (c * lax.rsqrt(ssq_b * inv_w + eps)).astype(o_ref.dtype)


@functools.partial(jax.jit, static_argnames=("eps", "block_bytes"))
def instance_norm_15d(x, eps=1e-5, block_bytes=2 * 1024 * 1024):
    """JAX/Pallas equivalent of InstanceNorm15d.forward.

    Accepts (N, C, H, W) or (N, E, C, H, W); normalizes every row over the
    last axis W (biased variance, eps inside the sqrt, no affine params).
    """
    if x.ndim not in (4, 5):
        raise ValueError("InstanceNorm15d expects 4D or 5D input")

    orig_shape = x.shape
    W = int(orig_shape[-1])
    rows = 1
    for d in orig_shape[:-1]:
        rows *= int(d)

    # --- lane packing: fold G consecutive rows into the 128-lane axis -------
    G = 1
    if W < 128 and (128 % W) == 0:            # => W is a power of two
        G = 128 // W
        while G > 1 and (rows % G) != 0:      # G is a power of two
            G //= 2
    L = G * W
    packed_rows = rows // G
    x2 = x.reshape(packed_rows, L)            # contiguous row-major: free reshape

    # --- row-tile choice: biggest block ~block_bytes that stays VMEM-safe ---
    itemsize = jnp.dtype(x.dtype).itemsize
    sub = {4: 8, 2: 16, 1: 32}.get(itemsize, 8)   # sublane packing granule
    lane_padded = max(L, 128)                     # VMEM lane padding for L < 128
    row_tile = block_bytes // (lane_padded * itemsize)
    row_tile = max(sub, min(int(row_tile), 4096))
    row_tile = (row_tile // sub) * sub
    row_tile = min(row_tile, pl.cdiv(packed_rows, sub) * sub)
    grid = (pl.cdiv(packed_rows, row_tile),)      # partial last block handled by Pallas
    # TODO(synk): for very large W (block > a few MiB even at 8 rows), add a
    # second grid axis over W with a two-pass sum/sumsq accumulator instead.

    compiler_params = pltpu.CompilerParams(dimension_semantics=("parallel",))

    if G > 1:
        group = jnp.arange(L, dtype=jnp.int32) // W
        seg = (group[:, None] == group[None, :]).astype(jnp.float32)   # (L, L)
        out = pl.pallas_call(
            functools.partial(_norm_packed_kernel, eps=eps, w=W),
            out_shape=jax.ShapeDtypeStruct((packed_rows, L), x.dtype),
            grid_spec=pltpu.PrefetchScalarGridSpec(
                num_scalar_prefetch=0,
                grid=grid,
                in_specs=[pl.BlockSpec((row_tile, L), lambda i: (i, 0)),
                          pl.BlockSpec((L, L), lambda i: (0, 0))],
                out_specs=pl.BlockSpec((row_tile, L), lambda i: (i, 0)),
            ),
            compiler_params=compiler_params,
        )(x2, seg)
    else:
        out = pl.pallas_call(
            functools.partial(_norm_rows_kernel, eps=eps),
            out_shape=jax.ShapeDtypeStruct((packed_rows, L), x.dtype),
            grid_spec=pltpu.PrefetchScalarGridSpec(
                num_scalar_prefetch=0,
                grid=grid,
                in_specs=[pl.BlockSpec((row_tile, L), lambda i: (i, 0))],
                out_specs=pl.BlockSpec((row_tile, L), lambda i: (i, 0)),
            ),
            compiler_params=compiler_params,
        )(x2)

    return out.reshape(orig_shape)


def _reference(x, eps=1e-5):
    xf = x.astype(jnp.float32)
    mean = jnp.mean(xf, axis=-1, keepdims=True)
    var = jnp.mean((xf - mean) ** 2, axis=-1, keepdims=True)
    return ((xf - mean) / jnp.sqrt(var + eps)).astype(x.dtype)


if __name__ == "__main__":
    key = jax.random.PRNGKey(0)
    k1, k2, k3 = jax.random.split(key, 3)

    # 4D case: (n, C, H, W) = (2, 4, 8, 16)  -> lane-packed path, 1 block
    x4 = jax.random.normal(k1, (2, 4, 8, 16), dtype=jnp.float32) * 3.0 + 1.5
    y4 = instance_norm_15d(x4)
    jax.block_until_ready(y4)

    # 5D case: (n, e, C, H, W) = (2, 3, 4, 8, 16) -> lane-packed path
    x5 = jax.random.normal(k2, (2, 3, 4, 8, 16), dtype=jnp.float32) * 0.7 - 2.0
    y5 = instance_norm_15d(x5)
    jax.block_until_ready(y5)

    # Larger 4D case exercising multi-step grid + partial final block
    # rows = 10*40*100 = 40000, G=8 -> 5000 packed rows, row_tile=4096, grid=2.
    x6 = jax.random.normal(k3, (10, 40, 100, 16), dtype=jnp.float32)
    y6 = instance_norm_15d(x6)
    jax.block_until_ready(y6)

    # Correctness checks against a pure-JAX reference of the PyTorch semantics.
    assert jnp.allclose(y4, _reference(x4), atol=1e-5, rtol=1e-5)
    assert jnp.allclose(y5, _reference(x5), atol=1e-5, rtol=1e-5)
    assert jnp.allclose(y6, _reference(x6), atol=1e-5, rtol=1e-5)
    assert y4.shape == x4.shape and y5.shape == x5.shape and y6.shape == x6.shape

    print("KERNEL_OK")
</pallas_src>

<mosaic_0001>
module attributes {stable_mosaic.version = 11 : i64} {
  func.func @_norm_packed_kernel(%arg0: i32, %arg1: memref<8x128xf32, #tpu.memory_space<vmem>>, %arg2: memref<128x128xf32, #tpu.memory_space<vmem>>, %arg3: memref<8x128xf32, #tpu.memory_space<vmem>>) attributes {dimension_semantics = [#tpu.dimension_semantics<parallel>], iteration_bounds = array<i64: 1>, scalar_prefetch = 0 : i64, scratch_operands = 0 : i64, tpu.core_type = #tpu.core_type<tc>, window_params = [{transform_indices = @transform_0, window_bounds = array<i64: 8, 128>}, {pipeline_mode = #tpu.pipeline_mode<synchronous>, transform_indices = @transform_1, window_bounds = array<i64: 128, 128>}, {transform_indices = @transform_2, window_bounds = array<i64: 8, 128>}]} {
    %c0 = arith.constant 0 : index
    %c0_0 = arith.constant 0 : index
    %0 = vector.load %arg1[%c0, %c0_0] : memref<8x128xf32, #tpu.memory_space<vmem>>, vector<8x128xf32>
    %c0_1 = arith.constant 0 : index
    %c0_2 = arith.constant 0 : index
    %1 = vector.load %arg2[%c0_1, %c0_2] : memref<128x128xf32, #tpu.memory_space<vmem>>, vector<128x128xf32>
    %cst = arith.constant dense<0.000000e+00> : vector<8x128xf32>
    %2 = tpu.matmul %0, %1, %cst {dimension_numbers = #tpu.dot_dimension_numbers<[1], [0], [0], [1], [0, 0, 1, 1], [], []>, precision = #tpu.contract_precision<fp32>} : vector<8x128xf32>, vector<128x128xf32>, vector<8x128xf32> -> vector<8x128xf32>
    %cst_3 = arith.constant 6.250000e-02 : f32
    %3 = vector.broadcast %cst_3 : f32 to vector<8x128xf32>
    %4 = arith.mulf %2, %3 : vector<8x128xf32>
    %5 = arith.subf %0, %4 : vector<8x128xf32>
    %6 = arith.mulf %5, %5 : vector<8x128xf32>
    %cst_4 = arith.constant dense<0.000000e+00> : vector<8x128xf32>
    %7 = tpu.matmul %6, %1, %cst_4 {dimension_numbers = #tpu.dot_dimension_numbers<[1], [0], [0], [1], [0, 0, 1, 1], [], []>, precision = #tpu.contract_precision<fp32>} : vector<8x128xf32>, vector<128x128xf32>, vector<8x128xf32> -> vector<8x128xf32>
    %cst_5 = arith.constant 6.250000e-02 : f32
    %8 = vector.broadcast %cst_5 : f32 to vector<8x128xf32>
    %9 = arith.mulf %7, %8 : vector<8x128xf32>
    %cst_6 = arith.constant 9.99999974E-6 : f32
    %10 = vector.broadcast %cst_6 : f32 to vector<8x128xf32>
    %11 = arith.addf %9, %10 : vector<8x128xf32>
    %12 = math.rsqrt %11 : vector<8x128xf32>
    %13 = arith.mulf %5, %12 : vector<8x128xf32>
    %c0_7 = arith.constant 0 : index
    %c0_8 = arith.constant 0 : index
    %14 = vector.load %arg3[%c0_7, %c0_8] : memref<8x128xf32, #tpu.memory_space<vmem>>, vector<8x128xf32>
    tpu.vector_store %arg3[%c0_7, %c0_8], %13 {strides = array<i32>} : memref<8x128xf32, #tpu.memory_space<vmem>>, vector<8x128xf32>,
    return
  }
  func.func @transform_0(%arg0: i32) -> (i32, i32) {
    %c0_i32 = arith.constant 0 : i32
    %c0_i32_0 = arith.constant 0 : i32
    return %arg0, %c0_i32 : i32, i32
  }
  func.func @transform_1(%arg0: i32) -> (i32, i32) {
    %c0_i32 = arith.constant 0 : i32
    %c0_i32_0 = arith.constant 0 : i32
    %c0_i32_1 = arith.constant 0 : i32
    return %c0_i32, %c0_i32_0 : i32, i32
  }
  func.func @transform_2(%arg0: i32) -> (i32, i32) {
    %c0_i32 = arith.constant 0 : i32
    %c0_i32_0 = arith.constant 0 : i32
    return %arg0, %c0_i32 : i32, i32
  }
}

</mosaic_0001>

<bundles_post_ra>
// kernel: instance_norm_15d.1
= control target key start
LH: loop header
LB: loop body
LE: loop exit
PB: predicated region body
PF: predicated region fallthrough
CT: control target
= control target key end

     0   :  { %s1197_s1 = inlined_call_operand.vmem [shape: f32[128,128], index: 1, kind: input, shape index: {}]   ;;  %s1198_s0 = inlined_call_operand.vmem [shape: f32[8,128], index: 0, kind: input, shape index: {}]   ;;  %s1199_s2 = inlined_call_operand.vmem [shape: f32[8,128], index: 2, kind: output, shape index: {}]  }
   0x1   :  { %v27_v0 = vld [vmem:[%s1197_s1 + $0x78] sm:$0xff]  ;;  %v26_v1 = vld [vmem:[%s1197_s1 + $0x70] sm:$0xff]  ;;  %v25_v2 = vld [vmem:[%s1197_s1 + $0x68] sm:$0xff] }
   0x2   :  { %v757_v3 = vand.u32 4294901760, %v27_v0  ;;  %v759_v4 = vand.u32 4294901760, %v26_v1  ;;  %v761_v5 = vand.u32 4294901760, %v25_v2  ;;  %v24_v6 = vld [vmem:[%s1197_s1 + $0x60] sm:$0xff]  ;;  %v23_v7 = vld [vmem:[%s1197_s1 + $0x58] sm:$0xff]  ;;  %v22_v8 = vld [vmem:[%s1197_s1 + $0x50] sm:$0xff] }
   0x3   :  { %v772_v9 = vand.u32 4294901760, %v24_v6  ;;  %v774_v10 = vand.u32 4294901760, %v23_v7  ;;  %v776_v11 = vand.u32 4294901760, %v22_v8  ;;  %v21_v12 = vld [vmem:[%s1197_s1 + $0x48] sm:$0xff]  ;;  %v20_v13 = vld [vmem:[%s1197_s1 + $0x40] sm:$0xff]  ;;  %v19_v18 = vld [vmem:[%s1197_s1 + $0x38] sm:$0xff] }
   0x4   :  { %29 = vmatpush.msra.mxu0 %v757_v3  ;;  %v786_v14 = vsub.f32 %v27_v0, %v757_v3  ;;  %v789_v15 = vsub.f32 %v26_v1, %v759_v4  ;;  %v792_v16 = vsub.f32 %v25_v2, %v761_v5  ;;  %v794_v17 = vand.u32 4294901760, %v21_v12  ;;  %225 = vmatpush.msra.mxu3 %v757_v3  ;;  %v18_v26 = vld [vmem:[%s1197_s1 + $0x30] sm:$0xff]  ;;  %v17_v36 = vld [vmem:[%s1197_s1 + $0x28] sm:$0xff]  ;;  %v16_v42 = vld [vmem:[%s1197_s1 + $0x20] sm:$0xff] }
   0x5   :  { %v801_v19 = vsub.f32 %v24_v6, %v772_v9  ;;  %v804_v20 = vsub.f32 %v23_v7, %v774_v10  ;;  %v807_v21 = vsub.f32 %v22_v8, %v776_v11  ;;  %v819_v25 = vand.u32 4294901760, %v20_v13  ;;  %v15_v47 = vld [vmem:[%s1197_s1 + $0x18] sm:$0xff]  ;;  %v14_v55 = vld [vmem:[%s1197_s1 + $0x10] sm:$0xff]  ;;  %v13_v60 = vld [vmem:[%s1197_s1 + $0x8] sm:$0xff] }
   0x6   :  { %31 = vmatpush.msra.mxu0 %v759_v4  ;;  %v811_v22 = vand.u32 4294901760, %v786_v14  ;;  %v814_v23 = vand.u32 4294901760, %v789_v15  ;;  %v817_v24 = vand.u32 4294901760, %v792_v16  ;;  %172 = vmatpush.msra.mxu2 %v786_v14  ;;  %v828_v28 = vand.u32 4294901760, %v19_v18  ;;  %v12_v1 = vld [vmem:[%s1197_s1] sm:$0xff] }
   0x7   :  { %v826_v27 = vand.u32 4294901760, %v801_v19  ;;  %v831_v29 = vsub.f32 %v21_v12, %v794_v17  ;;  %227 = vmatpush.msra.mxu3 %v759_v4  ;;  %v842_v33 = vand.u32 4294901760, %v804_v20  ;;  %v846_v34 = vand.u32 4294901760, %v807_v21  ;;  %v953_v7 = vld [vmem:[%s1198_s0] sm:$0xff] }
   0x8   :  { %33 = vmatpush.msra.mxu0 %v761_v5  ;;  %v72_v30 = vsub.f32 %v786_v14, %v811_v22  ;;  %v78_v31 = vsub.f32 %v789_v15, %v814_v23  ;;  %v84_v32 = vsub.f32 %v792_v16, %v817_v24  ;;  %175 = vmatpush.msra.mxu2 %v789_v15  ;;  %v848_v35 = vand.u32 4294901760, %v18_v26 }
   0x9   :  { %229 = vmatpush.msra.mxu3 %v761_v5  ;;  %v90_v39 = vsub.f32 %v801_v19, %v826_v27  ;;  %v862_v40 = vsub.f32 %v20_v13, %v819_v25  ;;  %v866_v41 = vand.u32 4294901760, %v831_v29  ;;  %v96_v44 = vsub.f32 %v804_v20, %v842_v33  ;;  %1214 = vst [vmem:[#allocation8_spill] sm:$0xff] %v953_v7 }
   0xa   :  { %v854_v37 = vand.u32 4294901760, %v72_v30  ;;  %35 = vmatpush.msra.mxu0 %v772_v9  ;;  %v857_v38 = vand.u32 4294901760, %v78_v31  ;;  %178 = vmatpush.msra.mxu2 %v792_v16  ;;  %v874_v43 = vand.u32 4294901760, %v84_v32  ;;  %v878_v45 = vand.u32 4294901760, %v17_v36 }
   0xb   :  { %1208 = vst [vmem:[#allocation2_spill] sm:$0xff] %v862_v40  ;;  %231 = vmatpush.msra.mxu3 %v772_v9  ;;  %v881_v46 = vsub.f32 %v19_v18, %v828_v28  ;;  %v102_v48 = vsub.f32 %v807_v21, %v846_v34  ;;  %v892_v49 = vand.u32 4294901760, %v90_v39  ;;  %v895_v50 = vand.u32 4294901760, %v862_v40 }
   0xc   :  { %74 = vmatpush.msra.mxu1 %v854_v37  ;;  %37 = vmatpush.msra.mxu0 %v774_v10  ;;  %v897_v51 = vand.u32 4294901760, %v16_v42  ;;  %v900_v52 = vsub.f32 %v18_v26, %v848_v35  ;;  %v108_v53 = vsub.f32 %v831_v29, %v866_v41  ;;  %v904_v54 = vand.u32 4294901760, %v15_v47 }
   0xd   :  { %1209 = vst [vmem:[#allocation3_spill] sm:$0xff] %v881_v46  ;;  %181 = vmatpush.msra.mxu2 %v801_v19  ;;  %233 = vmatpush.msra.mxu3 %v774_v10  ;;  %v913_v56 = vand.u32 4294901760, %v96_v44  ;;  %v916_v57 = vand.u32 4294901760, %v881_v46  ;;  %v919_v58 = vsub.f32 %v17_v36, %v878_v45  ;;  %v921_v59 = vand.u32 4294901760, %v102_v48 }
   0xe   :  { %80 = vmatpush.msra.mxu1 %v857_v38  ;;  %39 = vmatpush.msra.mxu0 %v776_v11  ;;  %1210 = vst [vmem:[#allocation4_spill] sm:$0xff] %v900_v52  ;;  %v114_v61 = vsub.f32 %v862_v40, %v895_v50  ;;  %v933_v62 = vand.u32 4294901760, %v900_v52  ;;  %v935_v63 = vand.u32 4294901760, %v14_v55  ;;  %v938_v0 = vsub.f32 %v16_v42, %v897_v51 }
   0xf   :  { %184 = vmatpush.msra.mxu2 %v804_v20  ;;  %235 = vmatpush.msra.mxu3 %v776_v11  ;;  %1211 = vst [vmem:[#allocation5_spill] sm:$0xff] %v919_v58  ;;  %v943_v2 = vand.u32 4294901760, %v108_v53  ;;  %v946_v6 = vsub.f32 %v15_v47, %v904_v54  ;;  %v120_v8 = vsub.f32 %v881_v46, %v916_v57  ;;  %v960_v12 = vand.u32 4294901760, %v919_v58 }
  0x10   :  { %86 = vmatpush.msra.mxu1 %v874_v43  ;;  %41 = vmatpush.msra.mxu0 %v794_v17  ;;  %1212 = vst [vmem:[#allocation6_spill] sm:$0xff] %v938_v0  ;;  %v962_v13 = vand.u32 4294901760, %v13_v60  ;;  %v965_v18 = vand.u32 4294901760, %v953_v7  ;;  %v967_v26 = vand.u32 4294901760, %v12_v1  ;;  %v973_v30 = vand.u32 4294901760, %v114_v61 }
  0x11   :  { %187 = vmatpush.msra.mxu2 %v807_v21  ;;  %237 = vmatpush.msra.mxu3 %v794_v17  ;;  %1213 = vst [vmem:[#allocation7_spill] sm:$0xff] %v946_v6  ;;  %v126_v31 = vsub.f32 %v900_v52, %v933_v62  ;;  %v978_v32 = vand.u32 4294901760, %v938_v0  ;;  %v981_v36 = vsub.f32 %v14_v55, %v935_v63  ;;  %v984_v39 = vand.u32 4294901760, %v946_v6 }
  0x12   :  { %92 = vmatpush.msra.mxu1 %v892_v49  ;;  %43 = vmatpush.msra.mxu0 %v819_v25  ;;  %v990_v42 = vand.u32 4294901760, %v120_v8  ;;  %v132_v44 = vsub.f32 %v919_v58, %v960_v12  ;;  %v995_v47 = vsub.f32 %v13_v60, %v962_v13  ;;  %v61_v48 = vsub.f32 %v953_v7, %v965_v18 }
  0x13   :  { %190 = vmatpush.msra.mxu2 %v831_v29  ;;  %239 = vmatpush.msra.mxu3 %v819_v25  ;;  %1215 = vst [vmem:[#allocation9_spill] sm:$0xff] %v981_v36  ;;  %v1003_v53 = vand.u32 4294901760, %v126_v31  ;;  %v138_v55 = vsub.f32 %v938_v0, %v978_v32  ;;  %v1008_v61 = vand.u32 4294901760, %v981_v36  ;;  %v1011_v60 = vsub.f32 %v12_v1, %v967_v26 }
  0x14   :  { %98 = vmatpush.msra.mxu1 %v913_v56  ;;  %45 = vmatpush.msra.mxu0 %v828_v28  ;;  %v1017_v8 = vand.u32 4294901760, %v132_v44  ;;  %v144_v31 = vsub.f32 %v946_v6, %v984_v39  ;;  %v1022_v7 = vand.u32 4294901760, %v995_v47 }
  0x15   :  { %193 = vmatpush.msra.mxu2 %v862_v40  ;;  %241 = vmatpush.msra.mxu3 %v828_v28  ;;  %v1028_v1 = vand.u32 4294901760, %v138_v55  ;;  %v150_v44 = vsub.f32 %v981_v36, %v1008_v61 }
  0x16   :  { %104 = vmatpush.msra.mxu1 %v921_v59  ;;  %47 = vmatpush.msra.mxu0 %v848_v35  ;;  %v156_v55 = vsub.f32 %v995_v47, %v1022_v7 }
  0x17   :  { %196 = vmatpush.msra.mxu2 %v881_v46  ;;  %243 = vmatpush.msra.mxu3 %v848_v35 }
  0x18   :  { %110 = vmatpush.msra.mxu1 %v943_v2  ;;  %49 = vmatpush.msra.mxu0 %v878_v45 }
  0x19   :  { %199 = vmatpush.msra.mxu2 %v900_v52  ;;  %245 = vmatpush.msra.mxu3 %v878_v45  ;;  %v62_v52 = vand.u32 4294901760, %v61_v48 }
  0x1a   :  { %116 = vmatpush.msra.mxu1 %v973_v30  ;;  %51 = vmatpush.msra.mxu0 %v897_v51 }
  0x1b   :  { %202 = vmatpush.msra.mxu2 %v919_v58  ;;  %247 = vmatpush.msra.mxu3 %v897_v51  ;;  %v1033_v58 = vand.u32 4294901760, %v1011_v60  ;;  %v63_v46 = vsub.f32 %v61_v48, %v62_v52 }
  0x1c   :  { %122 = vmatpush.msra.mxu1 %v990_v42  ;;  %53 = vmatpush.msra.mxu0 %v904_v54 }
  0x1d   :  { %205 = vmatpush.msra.mxu2 %v938_v0  ;;  %249 = vmatpush.msra.mxu3 %v904_v54  ;;  %v1039_v0 = vand.u32 4294901760, %v144_v31  ;;  %v162_v40 = vsub.f32 %v1011_v60, %v1033_v58  ;;  %v1054_v31 = vand.u32 4294901760, %v156_v55 }
  0x1e   :  { %128 = vmatpush.msra.mxu1 %v1003_v53  ;;  %55 = vmatpush.msra.mxu0 %v935_v63 }
  0x1f   :  { %208 = vmatpush.msra.mxu2 %v946_v6  ;;  %251 = vmatpush.msra.mxu3 %v935_v63  ;;  %v1047_v6 = vand.u32 4294901760, %v150_v44  ;;  %v1060_v44 = vand.u32 4294901760, %v162_v40 }
  0x20   :  { %134 = vmatpush.msra.mxu1 %v1017_v8  ;;  %57 = vmatpush.msra.mxu0 %v962_v13 }
  0x21   :  { %211 = vmatpush.msra.mxu2 %v981_v36  ;;  %253 = vmatpush.msra.mxu3 %v962_v13  ;;  %v64_v36 = vand.u32 4294901760, %v63_v46 }
  0x22   :  { %140 = vmatpush.msra.mxu1 %v1028_v1  ;;  %59 = vmatpush.msra.mxu0 %v967_v26 }
  0x23   :  { %214 = vmatpush.msra.mxu2 %v995_v47  ;;  %255 = vmatpush.msra.mxu3 %v967_v26 }
  0x24   :  { %266 = vmatpush.msrb.mxu0 %v811_v22  ;;  %146 = vmatpush.msra.mxu1 %v1039_v0 }
  0x25   :  { %217 = vmatpush.msra.mxu2 %v1011_v60  ;;  %259 = vmatmul.f32.vlgmr.msra.gmra.mxu3 %v62_v52 }
  0x26   :  { %270 = vmatpush.msrb.mxu0 %v814_v23  ;;  %152 = vmatpush.msra.mxu1 %v1047_v6 }
  0x27   :  { %220 = vmatmul.f32.vlgmr.msra.gmra.mxu2 %v61_v48  ;;  %65 = vmatmul.f32.vlgmr.msra.gmra.mxu0 %v64_v36 }
  0x28   :  { %274 = vmatpush.msrb.mxu0 %v817_v24  ;;  %158 = vmatpush.msra.mxu1 %v1054_v31 }
  0x29   :  { %418 = vmatpush.msrb.mxu3 %v854_v37  ;;  %373 = vmatpush.msrb.mxu2 %v757_v3 }
  0x2a   :  { %278 = vmatpush.msrb.mxu0 %v826_v27  ;;  %164 = vmatpush.msra.mxu1 %v1060_v44 }
  0x2b   :  { %166 = vmatmul.f32.vlgmr.msra.gmra.mxu1 %v965_v18  ;;  %424 = vmatpush.msrb.mxu3 %v857_v38 }
  0x2c   :  { %333 = vmatpush.msrb.mxu1 %v757_v3  ;;  %282 = vmatpush.msrb.mxu0 %v842_v33 }
  0x2d   :  { %430 = vmatpush.msrb.mxu3 %v874_v43  ;;  %375 = vmatpush.msrb.mxu2 %v759_v4 }
  0x2e   :  { %335 = vmatpush.msrb.mxu1 %v759_v4  ;;  %286 = vmatpush.msrb.mxu0 %v846_v34 }
  0x2f   :  { %436 = vmatpush.msrb.mxu3 %v892_v49  ;;  %377 = vmatpush.msrb.mxu2 %v761_v5 }
  0x30   :  { %337 = vmatpush.msrb.mxu1 %v761_v5  ;;  %290 = vmatpush.msrb.mxu0 %v866_v41 }
  0x31   :  { %442 = vmatpush.msrb.mxu3 %v913_v56  ;;  %379 = vmatpush.msrb.mxu2 %v772_v9 }
  0x32   :  { %339 = vmatpush.msrb.mxu1 %v772_v9  ;;  %294 = vmatpush.msrb.mxu0 %v895_v50 }
  0x33   :  { %448 = vmatpush.msrb.mxu3 %v921_v59  ;;  %381 = vmatpush.msrb.mxu2 %v774_v10 }
  0x34   :  { %341 = vmatpush.msrb.mxu1 %v774_v10  ;;  %298 = vmatpush.msrb.mxu0 %v916_v57 }
  0x35   :  { %454 = vmatpush.msrb.mxu3 %v943_v2  ;;  %383 = vmatpush.msrb.mxu2 %v776_v11 }
  0x36   :  { %343 = vmatpush.msrb.mxu1 %v776_v11  ;;  %302 = vmatpush.msrb.mxu0 %v933_v62 }
  0x37   :  { %460 = vmatpush.msrb.mxu3 %v973_v30  ;;  %385 = vmatpush.msrb.mxu2 %v794_v17 }
  0x38   :  { %345 = vmatpush.msrb.mxu1 %v794_v17  ;;  %306 = vmatpush.msrb.mxu0 %v960_v12 }
  0x39   :  { %466 = vmatpush.msrb.mxu3 %v990_v42  ;;  %387 = vmatpush.msrb.mxu2 %v819_v25 }
  0x3a   :  { %347 = vmatpush.msrb.mxu1 %v819_v25  ;;  %310 = vmatpush.msrb.mxu0 %v978_v32 }
  0x3b   :  { %472 = vmatpush.msrb.mxu3 %v1003_v53  ;;  %389 = vmatpush.msrb.mxu2 %v828_v28 }
  0x3c   :  { %349 = vmatpush.msrb.mxu1 %v828_v28  ;;  %314 = vmatpush.msrb.mxu0 %v984_v39 }
  0x3d   :  { %478 = vmatpush.msrb.mxu3 %v1017_v8  ;;  %391 = vmatpush.msrb.mxu2 %v848_v35 }
  0x3e   :  { %351 = vmatpush.msrb.mxu1 %v848_v35  ;;  %318 = vmatpush.msrb.mxu0 %v1008_v61 }
  0x3f   :  { %484 = vmatpush.msrb.mxu3 %v1028_v1  ;;  %393 = vmatpush.msrb.mxu2 %v878_v45 }
  0x40   :  { %353 = vmatpush.msrb.mxu1 %v878_v45  ;;  %322 = vmatpush.msrb.mxu0 %v1022_v7 }
  0x41   :  { %490 = vmatpush.msrb.mxu3 %v1039_v0  ;;  %395 = vmatpush.msrb.mxu2 %v897_v51 }
  0x42   :  { %355 = vmatpush.msrb.mxu1 %v897_v51  ;;  %326 = vmatpush.msrb.mxu0 %v1033_v58 }
  0x43   :  { %328 = vmatmul.f32.vlgmr.msrb.gmra.mxu0 %v965_v18  ;;  %496 = vmatpush.msrb.mxu3 %v1047_v6 }
  0x44   :  { %357 = vmatpush.msrb.mxu1 %v904_v54  ;;  %516 = vmatpush.msra.mxu0 %v786_v14  ;;  %v1222_v14 = vld [vmem:[#allocation9_spill] sm:$0xff] }
  0x45   :  { %502 = vmatpush.msrb.mxu3 %v1054_v31  ;;  %397 = vmatpush.msrb.mxu2 %v904_v54 }
  0x46   :  { %359 = vmatpush.msrb.mxu1 %v935_v63  ;;  %519 = vmatpush.msra.mxu0 %v789_v15 }
  0x47   :  { %508 = vmatpush.msrb.mxu3 %v1060_v44  ;;  %399 = vmatpush.msrb.mxu2 %v935_v63 }
  0x48   :  { %361 = vmatpush.msrb.mxu1 %v962_v13  ;;  %522 = vmatpush.msra.mxu0 %v792_v16 }
  0x49   :  { %677 = vmatpush.msra.mxu3 %v757_v3  ;;  %401 = vmatpush.msrb.mxu2 %v962_v13 }
  0x4a   :  { %363 = vmatpush.msrb.mxu1 %v967_v26  ;;  %525 = vmatpush.msra.mxu0 %v801_v19 }
  0x4b   :  { %365 = vmatmul.f32.vlgmr.msrb.gmra.mxu1 %v965_v18  ;;  %679 = vmatpush.msra.mxu3 %v759_v4 }
  0x4c   :  { %569 = vmatpush.msra.mxu1 %v757_v3  ;;  %528 = vmatpush.msra.mxu0 %v804_v20  ;;  %v1216_v3 = vld [vmem:[#allocation2_spill] sm:$0xff] }
  0x4d   :  { %681 = vmatpush.msra.mxu3 %v761_v5  ;;  %403 = vmatpush.msrb.mxu2 %v967_v26 }
  0x4e   :  { %571 = vmatpush.msra.mxu1 %v759_v4  ;;  %531 = vmatpush.msra.mxu0 %v807_v21  ;;  %v1217_v4 = vld [vmem:[#allocation3_spill] sm:$0xff] }
  0x4f   :  { %683 = vmatpush.msra.mxu3 %v772_v9  ;;  %610 = vmatpush.msra.mxu2 %v811_v22 }
  0x50   :  { %573 = vmatpush.msra.mxu1 %v761_v5  ;;  %534 = vmatpush.msra.mxu0 %v831_v29  ;;  %v1218_v5 = vld [vmem:[#allocation4_spill] sm:$0xff] }
  0x51   :  { %685 = vmatpush.msra.mxu3 %v774_v10  ;;  %614 = vmatpush.msra.mxu2 %v814_v23  ;;  %v1223_v29 = vld [vmem:[#allocation8_spill] sm:$0xff] }
  0x52   :  { %575 = vmatpush.msra.mxu1 %v772_v9  ;;  %537 = vmatpush.msra.mxu0 %v1216_v3  ;;  %v1219_v9 = vld [vmem:[#allocation5_spill] sm:$0xff] }
  0x53   :  { %687 = vmatpush.msra.mxu3 %v776_v11  ;;  %618 = vmatpush.msra.mxu2 %v817_v24 }
  0x54   :  { %577 = vmatpush.msra.mxu1 %v774_v10  ;;  %540 = vmatpush.msra.mxu0 %v1217_v4  ;;  %v1220_v10 = vld [vmem:[#allocation6_spill] sm:$0xff] }
  0x55   :  { %689 = vmatpush.msra.mxu3 %v794_v17  ;;  %622 = vmatpush.msra.mxu2 %v826_v27 }
  0x56   :  { %579 = vmatpush.msra.mxu1 %v776_v11  ;;  %543 = vmatpush.msra.mxu0 %v1218_v5  ;;  %v1221_v11 = vld [vmem:[#allocation7_spill] sm:$0xff] }
  0x57   :  { %691 = vmatpush.msra.mxu3 %v819_v25  ;;  %626 = vmatpush.msra.mxu2 %v842_v33 }
  0x58   :  { %581 = vmatpush.msra.mxu1 %v794_v17  ;;  %546 = vmatpush.msra.mxu0 %v1219_v9 }
  0x59   :  { %693 = vmatpush.msra.mxu3 %v828_v28  ;;  %630 = vmatpush.msra.mxu2 %v846_v34 }
  0x5a   :  { %583 = vmatpush.msra.mxu1 %v819_v25  ;;  %549 = vmatpush.msra.mxu0 %v1220_v10 }
  0x5b   :  { %695 = vmatpush.msra.mxu3 %v848_v35  ;;  %634 = vmatpush.msra.mxu2 %v866_v41 }
  0x5c   :  { %585 = vmatpush.msra.mxu1 %v828_v28  ;;  %552 = vmatpush.msra.mxu0 %v1221_v11 }
  0x5d   :  { %697 = vmatpush.msra.mxu3 %v878_v45  ;;  %638 = vmatpush.msra.mxu2 %v895_v50 }
  0x5e   :  { %587 = vmatpush.msra.mxu1 %v848_v35  ;;  %555 = vmatpush.msra.mxu0 %v1222_v14 }
  0x5f   :  { %699 = vmatpush.msra.mxu3 %v897_v51  ;;  %642 = vmatpush.msra.mxu2 %v916_v57 }
  0x60   :  { %589 = vmatpush.msra.mxu1 %v878_v45  ;;  %558 = vmatpush.msra.mxu0 %v995_v47 }
  0x61   :  { %701 = vmatpush.msra.mxu3 %v904_v54  ;;  %646 = vmatpush.msra.mxu2 %v933_v62 }
  0x62   :  { %591 = vmatpush.msra.mxu1 %v897_v51  ;;  %561 = vmatpush.msra.mxu0 %v1011_v60 }
  0x63   :  { %703 = vmatpush.msra.mxu3 %v935_v63  ;;  %650 = vmatpush.msra.mxu2 %v960_v12 }
  0x64   :  { %593 = vmatpush.msra.mxu1 %v904_v54 }
  0x65   :  { %705 = vmatpush.msra.mxu3 %v962_v13  ;;  %654 = vmatpush.msra.mxu2 %v978_v32 }
  0x66   :  { %595 = vmatpush.msra.mxu1 %v935_v63 }
  0x67   :  { %707 = vmatpush.msra.mxu3 %v967_v26  ;;  %658 = vmatpush.msra.mxu2 %v984_v39 }
  0x68   :  { %597 = vmatpush.msra.mxu1 %v962_v13 }
  0x69   :  { %662 = vmatpush.msra.mxu2 %v1008_v61 }
  0x6a   :  { %599 = vmatpush.msra.mxu1 %v967_v26 }
  0x6b   :  { %666 = vmatpush.msra.mxu2 %v1022_v7 }
  0x6d   :  { %670 = vmatpush.msra.mxu2 %v1033_v58 }
  0xa4   :  { %v66_v16 = vpop.f32.mrf.mxu0 }
  0xa8   :  { %v167_v15 = vpop.f32.mrf.mxu1  ;;  %v260_v21 = vpop.f32.mrf.mxu3 }
  0xa9   :  { %v168_v17 = vadd.f32 %v167_v15, %v66_v16 }
  0xaa   :  { %v221_v19 = vpop.f32.mrf.mxu2 }
  0xab   :  { %v222_v20 = vadd.f32 %v221_v19, %v168_v17 }
  0xad   :  { %v261_v22 = vadd.f32 %v260_v21, %v222_v20 }
  0xc0   :  { %v329_v23 = vpop.f32.mrf.mxu0 }
  0xc1   :  { %v330_v24 = vadd.f32 %v329_v23, %v261_v22 }
  0xc8   :  { %v366_v25 = vpop.f32.mrf.mxu1 }
  0xc9   :  { %v367_v27 = vadd.f32 %v366_v25, %v330_v24 }
  0xcb   :  { %v369_v28 = vmul.f32 0.0625, %v367_v27 }
  0xcd   :  { %v370_v33 = vsub.f32 %v1223_v29, %v369_v28 }
  0xcf   :  { %v371_v34 = vmul.f32 %v370_v33, %v370_v33 }
  0xd1   :  { %v404_v35 = vand.u32 4294901760, %v371_v34 }
  0xd3   :  { %v405_v37 = vsub.f32 %v371_v34, %v404_v35  ;;  %510 = vmatmul.f32.vlgmr.msrb.gmra.mxu3 %v404_v35 }
  0xd5   :  { %564 = vmatmul.f32.vlgmr.msra.gmra.mxu0 %v405_v37  ;;  %v406_v38 = vand.u32 4294901760, %v405_v37 }
  0xd7   :  { %603 = vmatmul.f32.vlgmr.msra.gmra.mxu1 %v406_v38  ;;  %v407_v40 = vsub.f32 %v405_v37, %v406_v38 }
  0xd9   :  { %v408_v41 = vand.u32 4294901760, %v407_v40 }
  0xdb   :  { %409 = vmatmul.f32.vlgmr.msrb.gmra.mxu2 %v408_v41  ;;  %709 = vmatmul.f32.vlgmr.msra.gmra.mxu3 %v404_v35 }
  0xe3   :  { %672 = vmatmul.f32.vlgmr.msra.gmra.mxu2 %v404_v35 }
 0x152   :  { %v565_v49 = vpop.f32.mrf.mxu0 }
 0x154   :  { %v604_v51 = vpop.f32.mrf.mxu1 }
 0x156   :  { %v511_v43 = vpop.f32.mrf.mxu3 }
 0x15e   :  { %v410_v45 = vpop.f32.mrf.mxu2  ;;  %v710_v57 = vpop.f32.mrf.mxu3 }
 0x15f   :  { %v512_v46 = vadd.f32 %v511_v43, %v410_v45 }
 0x161   :  { %v566_v50 = vadd.f32 %v565_v49, %v512_v46 }
 0x163   :  { %v605_v52 = vadd.f32 %v604_v51, %v566_v50 }
 0x166   :  { %v673_v54 = vpop.f32.mrf.mxu2 }
 0x167   :  { %v674_v56 = vadd.f32 %v673_v54, %v605_v52 }
 0x169   :  { %v711_v58 = vadd.f32 %v710_v57, %v674_v56 }
 0x16b   :  { %v713_v59 = vmul.f32 0.0625, %v711_v58 }
 0x16d   :  { %v714_v62 = vadd.f32 1e-05, %v713_v59 }
 0x16f   :  { %731 = vrsqrt.f32 %v714_v62  ;;  %vm721_vm1 = vweird.f32 %v714_v62 }
 0x175   :  { %v732_v63 = vpop.eup %731 }
 0x176   :  { %v716_v0 = vmul.f32 %v732_v63, %v714_v62  ;;  %vm722_vm0 = vweird.f32 %v732_v63 }
 0x177   :  { %vm723_vm2 = vmor %vm721_vm1, %vm722_vm0 }
 0x178   :  { %v717_v2 = vmul.f32 %v732_v63, %v716_v0 }
 0x17a   :  { %v718_v6 = vmul.f32 0.5, %v717_v2 }
 0x17c   :  { %v719_v7 = vsub.f32 1.5, %v718_v6 }
 0x17e   :  { %v720_v12 = vmul.f32 %v732_v63, %v719_v7 }
 0x180   :  { %v724_v13 = vsel %vm723_vm2, %v732_v63, %v720_v12 }
 0x181   :  { %v725_v18 = vmul.f32 %v724_v13, %v370_v33 }
 0x183   :  { %726 = vst [vmem:[%s1199_s2] sm:$0xff] %v725_v18 }

</bundles_post_ra>
